<compile_context>
chip_gen: v7x
topology: tpu7x:2x2x1
jax: 0.10.0
libtpu: 0.0.40
codegen_flags: <defaults>
</compile_context>

<pallas_src>
import functools

import jax
import jax.numpy as jnp
from jax.experimental import pallas as pl
from jax.experimental.pallas import tpu as pltpu


# ----------------------------------------------------------------------------
# Fully fused TCN-stack kernel (channels-first, lane-dense, whole stack/step)
# ----------------------------------------------------------------------------
def _tcn_stack_kernel(mask_ref, x_ref, *rest, meta, shift_rows, lp, mxu_dtype):
    """One grid step = the WHOLE TCN stack for nb lane-concatenated samples.

    Activations are (C, nb*Lp); sample s occupies lanes [s*Lp, (s+1)*Lp).
    Intermediate activations never touch HBM.
    """
    o_ref = rest[-1]
    refs = list(rest[:-1])

    def tap(v, shift):
        # v[c, t] -> v[c, t - shift], zero-filled at the left edge of every
        # per-sample Lp segment: one XLU roll + one VPU multiply.
        if shift == 0:
            return v
        if shift >= lp:
            return None                      # tap lies entirely in causal pad
        rolled = pltpu.roll(v, shift, axis=1)
        return rolled * mask_ref[pl.ds(shift_rows[shift], 1), :]

    def causal_conv(v, w_ref, b_ref, k, d):
        # Sum of K small dots (no im2col materialization); f32 accumulation.
        acc = None
        for kk in range(k):
            t = tap(v, (k - 1 - kk) * d)
            if t is None:
                continue
            part = jnp.dot(w_ref[kk], t.astype(mxu_dtype),
                           preferred_element_type=jnp.float32)
            acc = part if acc is None else acc + part
        if acc is None:
            acc = jnp.zeros((w_ref.shape[1], v.shape[1]), jnp.float32)
        return acc + b_ref[...]

    h = x_ref[...].astype(jnp.float32)
    i = 0
    for (k1, d1, k2, d2, has_down) in meta:
        w1, b1, w2, b2 = refs[i], refs[i + 1], refs[i + 2], refs[i + 3]
        i += 4
        h1 = jnp.maximum(causal_conv(h, w1, b1, k1, d1), 0.0)   # conv1+chomp+relu
        h2 = jnp.maximum(causal_conv(h1, w2, b2, k2, d2), 0.0)  # conv2+chomp+relu
        if has_down:                                            # 1x1 downsample
            wd, bd = refs[i], refs[i + 1]
            i += 2
            res = jnp.dot(wd[...], h.astype(mxu_dtype),
                          preferred_element_type=jnp.float32) + bd[...]
        else:
            res = h
        h = jnp.maximum(h2 + res, 0.0)                          # residual + relu
    o_ref[...] = h.astype(o_ref.dtype)


def _zero_index_map(ndim):
    return lambda *_: (0,) * ndim


def _pick_nb(n, lp, lane_budget=2048, min_programs=2):
    """Samples per grid step: amortize per-step overhead, but keep >=2 parallel
    programs when possible so both v7x TensorCores are fed."""
    cap = max(1, lane_budget // lp)
    if n >= min_programs:
        cap = min(cap, max(1, n // min_programs))
    for nb in range(min(cap, n), 0, -1):
        if n % nb == 0:
            return nb
    return 1


# ----------------------------------------------------------------------------
# Pallas forward pass (TemporalConvNet_Single.forward)
# ----------------------------------------------------------------------------
def pallas_tcn_forward(x_ncl, layers, mxu_dtype=jnp.float32):
    N, C, L = x_ncl.shape
    Lp = ((L + 127) // 128) * 128                      # lane-dense time length
    nb = _pick_nb(N, Lp)
    T = nb * Lp                                        # lane width per step

    # Pad the network-input channel dim to full f32 sublanes.  Safe only when
    # the first block has a downsample conv (padded zero channels are absorbed
    # by its zero-padded weight columns); otherwise keep C as-is (still correct).
    has_down0 = layers[0]['wd'] is not None
    Cp = ((C + 7) // 8) * 8 if has_down0 else C

    # Lane-dense slab (Cp, N*Lp); right pad of L is harmless (causal) and the
    # tail is sliced off at the end.
    xp = jnp.pad(x_ncl.astype(jnp.float32), ((0, 0), (0, Cp - C), (0, Lp - L)))
    x2 = jnp.transpose(xp, (1, 0, 2)).reshape(Cp, N * Lp)

    # Distinct causal-shift amounts across the whole stack -> one mask row each
    # (0 on the first `shift` lanes of every per-sample segment, 1 elsewhere).
    shift_set = set()
    for p in layers:
        for kk in range(p['k1']):
            shift_set.add((p['k1'] - 1 - kk) * p['d1'])
        for kk in range(p['k2']):
            shift_set.add((p['k2'] - 1 - kk) * p['d2'])
    shift_set.discard(0)
    shifts = sorted(s for s in shift_set if s < Lp)
    shift_rows = {s: i for i, s in enumerate(shifts)}
    pos = jnp.arange(T, dtype=jnp.int32) % Lp
    if shifts:
        masks = jnp.stack([(pos >= s) for s in shifts]).astype(jnp.float32)
    else:
        masks = jnp.ones((1, T), jnp.float32)

    # Per-layer weights: per-tap (K, Cout, Cin) matrices in the MXU feed dtype;
    # biases stay f32 (elementwise math is f32 on all generations).
    args = [masks, x2]
    in_specs = [pl.BlockSpec(masks.shape, _zero_index_map(2)),
                pl.BlockSpec((Cp, T), lambda n: (0, n))]
    meta = []
    cin_prev = Cp
    for p in layers:
        cout1, cin1, k1 = p['w1'].shape
        cout2, cin2, k2 = p['w2'].shape
        w1t = jnp.transpose(p['w1'], (2, 0, 1))        # (k1, cout1, cin1)
        if cin_prev > cin1:
            w1t = jnp.pad(w1t, ((0, 0), (0, 0), (0, cin_prev - cin1)))
        w2t = jnp.transpose(p['w2'], (2, 0, 1))        # (k2, cout2, cin2)
        layer_args = [w1t.astype(mxu_dtype),
                      p['b1'].reshape(-1, 1).astype(jnp.float32),
                      w2t.astype(mxu_dtype),
                      p['b2'].reshape(-1, 1).astype(jnp.float32)]
        has_down = p['wd'] is not None
        if has_down:
            wd = p['wd'][:, :, 0]                      # (cout2, cin1)
            if cin_prev > cin1:
                wd = jnp.pad(wd, ((0, 0), (0, cin_prev - cin1)))
            layer_args += [wd.astype(mxu_dtype),
                           p['bd'].reshape(-1, 1).astype(jnp.float32)]
        for a in layer_args:
            args.append(a)
            in_specs.append(pl.BlockSpec(a.shape, _zero_index_map(a.ndim)))
        meta.append((k1, p['d1'], k2, p['d2'], has_down))
        cin_prev = cout2

    cout_last = layers[-1]['w2'].shape[0]
    kernel = functools.partial(_tcn_stack_kernel, meta=tuple(meta),
                               shift_rows=shift_rows, lp=Lp, mxu_dtype=mxu_dtype)

    out2 = pl.pallas_call(
        kernel,
        out_shape=jax.ShapeDtypeStruct((cout_last, N * Lp), x_ncl.dtype),
        grid_spec=pltpu.PrefetchScalarGridSpec(
            num_scalar_prefetch=0,
            grid=(N // nb,),
            in_specs=in_specs,
            out_specs=pl.BlockSpec((cout_last, T), lambda n: (0, n)),
        ),
        compiler_params=pltpu.CompilerParams(
            dimension_semantics=("parallel",),
            # 48 MiB: far above actual need, under v7x's 64 MiB physical VMEM
            # (v5e/v6e have 128 MiB of headroom).
            vmem_limit_bytes=48 * 1024 * 1024,
        ),
    )(*args)

    out = out2.reshape(cout_last, N, Lp).transpose(1, 0, 2)[:, :, :L]
    return out.astype(x_ncl.dtype)


# ----------------------------------------------------------------------------
# Parameter construction (deterministic, mirrors the module's __init__ shapes)
# ----------------------------------------------------------------------------
def _weight_norm_weight(kv, kg, shape):
    # PyTorch weight_norm(dim=0): w = g * v / ||v|| over dims (1, 2)
    v = jax.random.normal(kv, shape, jnp.float32) * 0.05
    g = 0.5 + 0.5 * jax.random.uniform(kg, (shape[0], 1, 1), jnp.float32)
    norm = jnp.sqrt(jnp.sum(v * v, axis=(1, 2), keepdims=True))
    return g * v / norm


def init_params(key, in_channels, out_channels, kernel_size):
    layers = []
    for i in range(len(out_channels)):
        key, *ks = jax.random.split(key, 9)
        d1, d2 = 2 ** i, 2 ** (i + 1)
        cin1, cin2 = in_channels[i]
        cout1, cout2 = out_channels[i]
        k1, k2 = kernel_size[i]
        w1 = _weight_norm_weight(ks[0], ks[1], (cout1, cin1, k1))   # (O, I, K)
        b1 = jax.random.normal(ks[2], (cout1,), jnp.float32) * 0.05
        w2 = _weight_norm_weight(ks[3], ks[4], (cout2, cin2, k2))
        b2 = jax.random.normal(ks[5], (cout2,), jnp.float32) * 0.05
        if cin1 != cout2:
            wd = jax.random.normal(ks[6], (cout2, cin1, 1), jnp.float32) * 0.05
            bd = jax.random.normal(ks[7], (cout2,), jnp.float32) * 0.05
        else:
            wd, bd = None, None
        layers.append(dict(w1=w1, b1=b1, w2=w2, b2=b2, wd=wd, bd=bd,
                           d1=d1, d2=d2, k1=k1, k2=k2))
    return layers


# ----------------------------------------------------------------------------
# Pure-JAX reference mirroring the PyTorch module (for correctness checking)
# ----------------------------------------------------------------------------
def _ref_conv1d(x, w, b, padding, dilation):
    y = jax.lax.conv_general_dilated(
        x, w, window_strides=(1,), padding=[(padding, padding)],
        rhs_dilation=(dilation,), dimension_numbers=('NCH', 'OIH', 'NCH'))
    return y + b[None, :, None]


def ref_tcn_forward(x, layers):
    h = x
    for p in layers:
        pad1 = (p['k1'] - 1) * p['d1']
        o = _ref_conv1d(h, p['w1'], p['b1'], pad1, p['d1'])
        o = o[:, :, :-pad1] if pad1 > 0 else o          # Chomp1d
        o = jnp.maximum(o, 0.0)                         # relu1 (dropout = id)
        pad2 = (p['k2'] - 1) * p['d2']
        o = _ref_conv1d(o, p['w2'], p['b2'], pad2, p['d2'])
        o = o[:, :, :-pad2] if pad2 > 0 else o
        o = jnp.maximum(o, 0.0)                         # relu2
        res = h if p['wd'] is None else _ref_conv1d(h, p['wd'], p['bd'], 0, 1)
        h = jnp.maximum(o + res, 0.0)
    return h


# ----------------------------------------------------------------------------
if __name__ == "__main__":
    # Config consistent with the module's constructor:
    #   2 levels, kernel_size=[[2,2],[2,2]], dilations [1,2] then [2,4]
    in_channels = [[4, 8], [8, 8]]
    out_channels = [[8, 8], [8, 8]]
    kernel_size = [[2, 2], [2, 2]]
    N, L = 2, 16

    key = jax.random.PRNGKey(0)
    kx, kp, kx4 = jax.random.split(key, 3)
    layers = init_params(kp, in_channels, out_channels, kernel_size)

    # f32 path, nb=1 (2 parallel grid programs): strict check vs reference
    x = jax.random.normal(kx, (N, in_channels[0][0], L), jnp.float32)   # NCL
    out = jax.block_until_ready(pallas_tcn_forward(x, layers))
    ref = ref_tcn_forward(x, layers)
    assert out.shape == ref.shape == (N, out_channels[-1][-1], L)
    assert jnp.allclose(out, ref, atol=2e-4, rtol=2e-4), "f32 mismatch vs reference"

    # nb=2 path (2 samples lane-concatenated per grid step): strict check,
    # exercises the batch-boundary masking of the causal shifts.
    x4 = jax.random.normal(kx4, (4, in_channels[0][0], L), jnp.float32)
    out4 = jax.block_until_ready(pallas_tcn_forward(x4, layers))
    ref4 = ref_tcn_forward(x4, layers)
    assert jnp.allclose(out4, ref4, atol=2e-4, rtol=2e-4), "nb=2 mismatch vs reference"

    # bf16 MXU-feed path (elementwise math stays f32): loose check
    out_bf16 = jax.block_until_ready(
        pallas_tcn_forward(x, layers, mxu_dtype=jnp.bfloat16))
    assert out_bf16.shape == ref.shape
    assert bool(jnp.all(jnp.isfinite(out_bf16)))
    assert float(jnp.max(jnp.abs(out_bf16.astype(jnp.float32) - ref))) < 0.1

    print("KERNEL_OK")
</pallas_src>

<mosaic_0001>
module attributes {stable_mosaic.version = 11 : i64} {
  func.func @_tcn_stack_kernel(%arg0: i32, %arg1: memref<3x128xf32, #tpu.memory_space<vmem>>, %arg2: memref<8x128xf32, #tpu.memory_space<vmem>>, %arg3: memref<2x8x8xf32, #tpu.memory_space<vmem>>, %arg4: memref<8x1xf32, #tpu.memory_space<vmem>>, %arg5: memref<2x8x8xf32, #tpu.memory_space<vmem>>, %arg6: memref<8x1xf32, #tpu.memory_space<vmem>>, %arg7: memref<8x8xf32, #tpu.memory_space<vmem>>, %arg8: memref<8x1xf32, #tpu.memory_space<vmem>>, %arg9: memref<2x8x8xf32, #tpu.memory_space<vmem>>, %arg10: memref<8x1xf32, #tpu.memory_space<vmem>>, %arg11: memref<2x8x8xf32, #tpu.memory_space<vmem>>, %arg12: memref<8x1xf32, #tpu.memory_space<vmem>>, %arg13: memref<8x128xf32, #tpu.memory_space<vmem>>) attributes {dimension_semantics = [#tpu.dimension_semantics<parallel>], iteration_bounds = array<i64: 2>, scalar_prefetch = 0 : i64, scratch_operands = 0 : i64, tpu.core_type = #tpu.core_type<tc>, window_params = [{pipeline_mode = #tpu.pipeline_mode<synchronous>, transform_indices = @transform_0, window_bounds = array<i64: 3, 128>}, {transform_indices = @transform_1, window_bounds = array<i64: 8, 128>}, {pipeline_mode = #tpu.pipeline_mode<synchronous>, transform_indices = @transform_2, window_bounds = array<i64: 2, 8, 8>}, {pipeline_mode = #tpu.pipeline_mode<synchronous>, transform_indices = @transform_3, window_bounds = array<i64: 8, 1>}, {pipeline_mode = #tpu.pipeline_mode<synchronous>, transform_indices = @transform_4, window_bounds = array<i64: 2, 8, 8>}, {pipeline_mode = #tpu.pipeline_mode<synchronous>, transform_indices = @transform_5, window_bounds = array<i64: 8, 1>}, {pipeline_mode = #tpu.pipeline_mode<synchronous>, transform_indices = @transform_6, window_bounds = array<i64: 8, 8>}, {pipeline_mode = #tpu.pipeline_mode<synchronous>, transform_indices = @transform_7, window_bounds = array<i64: 8, 1>}, {pipeline_mode = #tpu.pipeline_mode<synchronous>, transform_indices = @transform_8, window_bounds = array<i64: 2, 8, 8>}, {pipeline_mode = #tpu.pipeline_mode<synchronous>, transform_indices = @transform_9, window_bounds = array<i64: 8, 1>}, {pipeline_mode = #tpu.pipeline_mode<synchronous>, transform_indices = @transform_10, window_bounds = array<i64: 2, 8, 8>}, {pipeline_mode = #tpu.pipeline_mode<synchronous>, transform_indices = @transform_11, window_bounds = array<i64: 8, 1>}, {transform_indices = @transform_12, window_bounds = array<i64: 8, 128>}]} {
    %c0 = arith.constant 0 : index
    %c0_0 = arith.constant 0 : index
    %0 = vector.load %arg2[%c0, %c0_0] : memref<8x128xf32, #tpu.memory_space<vmem>>, vector<8x128xf32>
    %c1_i32 = arith.constant 1 : i32
    %1 = tpu.dynamic_rotate %0 by %c1_i32 dim 1 : vector<8x128xf32>, i32 -> vector<8x128xf32>
    %c0_1 = arith.constant 0 : index
    %c0_2 = arith.constant 0 : index
    %2 = vector.load %arg1[%c0_1, %c0_2] : memref<3x128xf32, #tpu.memory_space<vmem>>, vector<1x128xf32>
    %3 = vector.broadcast %2 : vector<1x128xf32> to vector<8x128xf32>
    %4 = arith.mulf %1, %3 : vector<8x128xf32>
    %c0_3 = arith.constant 0 : index
    %c0_4 = arith.constant 0 : index
    %c0_5 = arith.constant 0 : index
    %5 = vector.load %arg3[%c0_3, %c0_4, %c0_5] : memref<2x8x8xf32, #tpu.memory_space<vmem>>, vector<1x8x8xf32>
    %6 = vector.shape_cast %5 : vector<1x8x8xf32> to vector<8x8xf32>
    %cst = arith.constant dense<0.000000e+00> : vector<8x128xf32>
    %7 = tpu.matmul %6, %4, %cst {dimension_numbers = #tpu.dot_dimension_numbers<[1], [0], [0], [1], [0, 0, 1, 1], [], []>} : vector<8x8xf32>, vector<8x128xf32>, vector<8x128xf32> -> vector<8x128xf32>
    %c1 = arith.constant 1 : index
    %c0_6 = arith.constant 0 : index
    %c0_7 = arith.constant 0 : index
    %8 = vector.load %arg3[%c1, %c0_6, %c0_7] : memref<2x8x8xf32, #tpu.memory_space<vmem>>, vector<1x8x8xf32>
    %9 = vector.shape_cast %8 : vector<1x8x8xf32> to vector<8x8xf32>
    %cst_8 = arith.constant dense<0.000000e+00> : vector<8x128xf32>
    %10 = tpu.matmul %9, %0, %cst_8 {dimension_numbers = #tpu.dot_dimension_numbers<[1], [0], [0], [1], [0, 0, 1, 1], [], []>} : vector<8x8xf32>, vector<8x128xf32>, vector<8x128xf32> -> vector<8x128xf32>
    %11 = arith.addf %7, %10 : vector<8x128xf32>
    %c0_9 = arith.constant 0 : index
    %c0_10 = arith.constant 0 : index
    %12 = vector.load %arg4[%c0_9, %c0_10] : memref<8x1xf32, #tpu.memory_space<vmem>>, vector<8x1xf32>
    %13 = vector.broadcast %12 : vector<8x1xf32> to vector<8x128xf32>
    %14 = arith.addf %11, %13 : vector<8x128xf32>
    %cst_11 = arith.constant 0.000000e+00 : f32
    %15 = vector.broadcast %cst_11 : f32 to vector<8x128xf32>
    %16 = arith.maximumf %14, %15 : vector<8x128xf32>
    %c2_i32 = arith.constant 2 : i32
    %17 = tpu.dynamic_rotate %16 by %c2_i32 dim 1 : vector<8x128xf32>, i32 -> vector<8x128xf32>
    %c1_12 = arith.constant 1 : index
    %c0_13 = arith.constant 0 : index
    %18 = vector.load %arg1[%c1_12, %c0_13] : memref<3x128xf32, #tpu.memory_space<vmem>>, vector<1x128xf32>
    %19 = vector.broadcast %18 : vector<1x128xf32> to vector<8x128xf32>
    %20 = arith.mulf %17, %19 : vector<8x128xf32>
    %c0_14 = arith.constant 0 : index
    %c0_15 = arith.constant 0 : index
    %c0_16 = arith.constant 0 : index
    %21 = vector.load %arg5[%c0_14, %c0_15, %c0_16] : memref<2x8x8xf32, #tpu.memory_space<vmem>>, vector<1x8x8xf32>
    %22 = vector.shape_cast %21 : vector<1x8x8xf32> to vector<8x8xf32>
    %cst_17 = arith.constant dense<0.000000e+00> : vector<8x128xf32>
    %23 = tpu.matmul %22, %20, %cst_17 {dimension_numbers = #tpu.dot_dimension_numbers<[1], [0], [0], [1], [0, 0, 1, 1], [], []>} : vector<8x8xf32>, vector<8x128xf32>, vector<8x128xf32> -> vector<8x128xf32>
    %c1_18 = arith.constant 1 : index
    %c0_19 = arith.constant 0 : index
    %c0_20 = arith.constant 0 : index
    %24 = vector.load %arg5[%c1_18, %c0_19, %c0_20] : memref<2x8x8xf32, #tpu.memory_space<vmem>>, vector<1x8x8xf32>
    %25 = vector.shape_cast %24 : vector<1x8x8xf32> to vector<8x8xf32>
    %cst_21 = arith.constant dense<0.000000e+00> : vector<8x128xf32>
    %26 = tpu.matmul %25, %16, %cst_21 {dimension_numbers = #tpu.dot_dimension_numbers<[1], [0], [0], [1], [0, 0, 1, 1], [], []>} : vector<8x8xf32>, vector<8x128xf32>, vector<8x128xf32> -> vector<8x128xf32>
    %27 = arith.addf %23, %26 : vector<8x128xf32>
    %c0_22 = arith.constant 0 : index
    %c0_23 = arith.constant 0 : index
    %28 = vector.load %arg6[%c0_22, %c0_23] : memref<8x1xf32, #tpu.memory_space<vmem>>, vector<8x1xf32>
    %29 = vector.broadcast %28 : vector<8x1xf32> to vector<8x128xf32>
    %30 = arith.addf %27, %29 : vector<8x128xf32>
    %cst_24 = arith.constant 0.000000e+00 : f32
    %31 = vector.broadcast %cst_24 : f32 to vector<8x128xf32>
    %32 = arith.maximumf %30, %31 : vector<8x128xf32>
    %c0_25 = arith.constant 0 : index
    %c0_26 = arith.constant 0 : index
    %33 = vector.load %arg7[%c0_25, %c0_26] : memref<8x8xf32, #tpu.memory_space<vmem>>, vector<8x8xf32>
    %cst_27 = arith.constant dense<0.000000e+00> : vector<8x128xf32>
    %34 = tpu.matmul %33, %0, %cst_27 {dimension_numbers = #tpu.dot_dimension_numbers<[1], [0], [0], [1], [0, 0, 1, 1], [], []>} : vector<8x8xf32>, vector<8x128xf32>, vector<8x128xf32> -> vector<8x128xf32>
    %c0_28 = arith.constant 0 : index
    %c0_29 = arith.constant 0 : index
    %35 = vector.load %arg8[%c0_28, %c0_29] : memref<8x1xf32, #tpu.memory_space<vmem>>, vector<8x1xf32>
    %36 = vector.broadcast %35 : vector<8x1xf32> to vector<8x128xf32>
    %37 = arith.addf %34, %36 : vector<8x128xf32>
    %38 = arith.addf %32, %37 : vector<8x128xf32>
    %cst_30 = arith.constant 0.000000e+00 : f32
    %39 = vector.broadcast %cst_30 : f32 to vector<8x128xf32>
    %40 = arith.maximumf %38, %39 : vector<8x128xf32>
    %c2_i32_31 = arith.constant 2 : i32
    %41 = tpu.dynamic_rotate %40 by %c2_i32_31 dim 1 : vector<8x128xf32>, i32 -> vector<8x128xf32>
    %c1_32 = arith.constant 1 : index
    %c0_33 = arith.constant 0 : index
    %42 = vector.load %arg1[%c1_32, %c0_33] : memref<3x128xf32, #tpu.memory_space<vmem>>, vector<1x128xf32>
    %43 = vector.broadcast %42 : vector<1x128xf32> to vector<8x128xf32>
    %44 = arith.mulf %41, %43 : vector<8x128xf32>
    %c0_34 = arith.constant 0 : index
    %c0_35 = arith.constant 0 : index
    %c0_36 = arith.constant 0 : index
    %45 = vector.load %arg9[%c0_34, %c0_35, %c0_36] : memref<2x8x8xf32, #tpu.memory_space<vmem>>, vector<1x8x8xf32>
    %46 = vector.shape_cast %45 : vector<1x8x8xf32> to vector<8x8xf32>
    %cst_37 = arith.constant dense<0.000000e+00> : vector<8x128xf32>
    %47 = tpu.matmul %46, %44, %cst_37 {dimension_numbers = #tpu.dot_dimension_numbers<[1], [0], [0], [1], [0, 0, 1, 1], [], []>} : vector<8x8xf32>, vector<8x128xf32>, vector<8x128xf32> -> vector<8x128xf32>
    %c1_38 = arith.constant 1 : index
    %c0_39 = arith.constant 0 : index
    %c0_40 = arith.constant 0 : index
    %48 = vector.load %arg9[%c1_38, %c0_39, %c0_40] : memref<2x8x8xf32, #tpu.memory_space<vmem>>, vector<1x8x8xf32>
    %49 = vector.shape_cast %48 : vector<1x8x8xf32> to vector<8x8xf32>
    %cst_41 = arith.constant dense<0.000000e+00> : vector<8x128xf32>
    %50 = tpu.matmul %49, %40, %cst_41 {dimension_numbers = #tpu.dot_dimension_numbers<[1], [0], [0], [1], [0, 0, 1, 1], [], []>} : vector<8x8xf32>, vector<8x128xf32>, vector<8x128xf32> -> vector<8x128xf32>
    %51 = arith.addf %47, %50 : vector<8x128xf32>
    %c0_42 = arith.constant 0 : index
    %c0_43 = arith.constant 0 : index
    %52 = vector.load %arg10[%c0_42, %c0_43] : memref<8x1xf32, #tpu.memory_space<vmem>>, vector<8x1xf32>
    %53 = vector.broadcast %52 : vector<8x1xf32> to vector<8x128xf32>
    %54 = arith.addf %51, %53 : vector<8x128xf32>
    %cst_44 = arith.constant 0.000000e+00 : f32
    %55 = vector.broadcast %cst_44 : f32 to vector<8x128xf32>
    %56 = arith.maximumf %54, %55 : vector<8x128xf32>
    %c4_i32 = arith.constant 4 : i32
    %57 = tpu.dynamic_rotate %56 by %c4_i32 dim 1 : vector<8x128xf32>, i32 -> vector<8x128xf32>
    %c2 = arith.constant 2 : index
    %c0_45 = arith.constant 0 : index
    %58 = vector.load %arg1[%c2, %c0_45] : memref<3x128xf32, #tpu.memory_space<vmem>>, vector<1x128xf32>
    %59 = vector.broadcast %58 : vector<1x128xf32> to vector<8x128xf32>
    %60 = arith.mulf %57, %59 : vector<8x128xf32>
    %c0_46 = arith.constant 0 : index
    %c0_47 = arith.constant 0 : index
    %c0_48 = arith.constant 0 : index
    %61 = vector.load %arg11[%c0_46, %c0_47, %c0_48] : memref<2x8x8xf32, #tpu.memory_space<vmem>>, vector<1x8x8xf32>
    %62 = vector.shape_cast %61 : vector<1x8x8xf32> to vector<8x8xf32>
    %cst_49 = arith.constant dense<0.000000e+00> : vector<8x128xf32>
    %63 = tpu.matmul %62, %60, %cst_49 {dimension_numbers = #tpu.dot_dimension_numbers<[1], [0], [0], [1], [0, 0, 1, 1], [], []>} : vector<8x8xf32>, vector<8x128xf32>, vector<8x128xf32> -> vector<8x128xf32>
    %c1_50 = arith.constant 1 : index
    %c0_51 = arith.constant 0 : index
    %c0_52 = arith.constant 0 : index
    %64 = vector.load %arg11[%c1_50, %c0_51, %c0_52] : memref<2x8x8xf32, #tpu.memory_space<vmem>>, vector<1x8x8xf32>
    %65 = vector.shape_cast %64 : vector<1x8x8xf32> to vector<8x8xf32>
    %cst_53 = arith.constant dense<0.000000e+00> : vector<8x128xf32>
    %66 = tpu.matmul %65, %56, %cst_53 {dimension_numbers = #tpu.dot_dimension_numbers<[1], [0], [0], [1], [0, 0, 1, 1], [], []>} : vector<8x8xf32>, vector<8x128xf32>, vector<8x128xf32> -> vector<8x128xf32>
    %67 = arith.addf %63, %66 : vector<8x128xf32>
    %c0_54 = arith.constant 0 : index
    %c0_55 = arith.constant 0 : index
    %68 = vector.load %arg12[%c0_54, %c0_55] : memref<8x1xf32, #tpu.memory_space<vmem>>, vector<8x1xf32>
    %69 = vector.broadcast %68 : vector<8x1xf32> to vector<8x128xf32>
    %70 = arith.addf %67, %69 : vector<8x128xf32>
    %cst_56 = arith.constant 0.000000e+00 : f32
    %71 = vector.broadcast %cst_56 : f32 to vector<8x128xf32>
    %72 = arith.maximumf %70, %71 : vector<8x128xf32>
    %73 = arith.addf %72, %40 : vector<8x128xf32>
    %cst_57 = arith.constant 0.000000e+00 : f32
    %74 = vector.broadcast %cst_57 : f32 to vector<8x128xf32>
    %75 = arith.maximumf %73, %74 : vector<8x128xf32>
    %c0_58 = arith.constant 0 : index
    %c0_59 = arith.constant 0 : index
    %76 = vector.load %arg13[%c0_58, %c0_59] : memref<8x128xf32, #tpu.memory_space<vmem>>, vector<8x128xf32>
    tpu.vector_store %arg13[%c0_58, %c0_59], %75 {strides = array<i32>} : memref<8x128xf32, #tpu.memory_space<vmem>>, vector<8x128xf32>,
    return
  }
  func.func @transform_0(%arg0: i32) -> (i32, i32) {
    %c0_i32 = arith.constant 0 : i32
    %c0_i32_0 = arith.constant 0 : i32
    %c0_i32_1 = arith.constant 0 : i32
    return %c0_i32, %c0_i32_0 : i32, i32
  }
  func.func @transform_1(%arg0: i32) -> (i32, i32) {
    %c0_i32 = arith.constant 0 : i32
    %c0_i32_0 = arith.constant 0 : i32
    return %c0_i32, %arg0 : i32, i32
  }
  func.func @transform_2(%arg0: i32) -> (i32, i32, i32) {
    %c0_i32 = arith.constant 0 : i32
    %c0_i32_0 = arith.constant 0 : i32
    %c0_i32_1 = arith.constant 0 : i32
    %c0_i32_2 = arith.constant 0 : i32
    return %c0_i32, %c0_i32_0, %c0_i32_1 : i32, i32, i32
  }
  func.func @transform_3(%arg0: i32) -> (i32, i32) {
    %c0_i32 = arith.constant 0 : i32
    %c0_i32_0 = arith.constant 0 : i32
    %c0_i32_1 = arith.constant 0 : i32
    return %c0_i32, %c0_i32_0 : i32, i32
  }
  func.func @transform_4(%arg0: i32) -> (i32, i32, i32) {
    %c0_i32 = arith.constant 0 : i32
    %c0_i32_0 = arith.constant 0 : i32
    %c0_i32_1 = arith.constant 0 : i32
    %c0_i32_2 = arith.constant 0 : i32
    return %c0_i32, %c0_i32_0, %c0_i32_1 : i32, i32, i32
  }
  func.func @transform_5(%arg0: i32) -> (i32, i32) {
    %c0_i32 = arith.constant 0 : i32
    %c0_i32_0 = arith.constant 0 : i32
    %c0_i32_1 = arith.constant 0 : i32
    return %c0_i32, %c0_i32_0 : i32, i32
  }
  func.func @transform_6(%arg0: i32) -> (i32, i32) {
    %c0_i32 = arith.constant 0 : i32
    %c0_i32_0 = arith.constant 0 : i32
    %c0_i32_1 = arith.constant 0 : i32
    return %c0_i32, %c0_i32_0 : i32, i32
  }
  func.func @transform_7(%arg0: i32) -> (i32, i32) {
    %c0_i32 = arith.constant 0 : i32
    %c0_i32_0 = arith.constant 0 : i32
    %c0_i32_1 = arith.constant 0 : i32
    return %c0_i32, %c0_i32_0 : i32, i32
  }
  func.func @transform_8(%arg0: i32) -> (i32, i32, i32) {
    %c0_i32 = arith.constant 0 : i32
    %c0_i32_0 = arith.constant 0 : i32
    %c0_i32_1 = arith.constant 0 : i32
    %c0_i32_2 = arith.constant 0 : i32
    return %c0_i32, %c0_i32_0, %c0_i32_1 : i32, i32, i32
  }
  func.func @transform_9(%arg0: i32) -> (i32, i32) {
    %c0_i32 = arith.constant 0 : i32
    %c0_i32_0 = arith.constant 0 : i32
    %c0_i32_1 = arith.constant 0 : i32
    return %c0_i32, %c0_i32_0 : i32, i32
  }
  func.func @transform_10(%arg0: i32) -> (i32, i32, i32) {
    %c0_i32 = arith.constant 0 : i32
    %c0_i32_0 = arith.constant 0 : i32
    %c0_i32_1 = arith.constant 0 : i32
    %c0_i32_2 = arith.constant 0 : i32
    return %c0_i32, %c0_i32_0, %c0_i32_1 : i32, i32, i32
  }
  func.func @transform_11(%arg0: i32) -> (i32, i32) {
    %c0_i32 = arith.constant 0 : i32
    %c0_i32_0 = arith.constant 0 : i32
    %c0_i32_1 = arith.constant 0 : i32
    return %c0_i32, %c0_i32_0 : i32, i32
  }
  func.func @transform_12(%arg0: i32) -> (i32, i32) {
    %c0_i32 = arith.constant 0 : i32
    %c0_i32_0 = arith.constant 0 : i32
    return %c0_i32, %arg0 : i32, i32
  }
}

</mosaic_0001>

<bundles_post_ra>
// kernel: tpu_custom_call.1
= control target key start
LH: loop header
LB: loop body
LE: loop exit
PB: predicated region body
PF: predicated region fallthrough
CT: control target
= control target key end

     0   :  { %17 = vsyncpa [#allocation3], 0  ;;  %s1884_s0 = inlined_call_operand.hbm [shape: f32[3,128], index: 0, kind: input, shape index: {}]   ;;  %s1885_s1 = inlined_call_operand.vmem [shape: f32[8,256], index: 1, kind: input, shape index: {}]   ;;  %s1886_s2 = inlined_call_operand.vmem [shape: f32[2,8,8], index: 2, kind: input, shape index: {}]   ;;  %s1887_s3 = inlined_call_operand.vmem [shape: f32[8,1], index: 3, kind: input, shape index: {}]   ;;  %s1888_s4 = inlined_call_operand.vmem [shape: f32[2,8,8], index: 4, kind: input, shape index: {}]   ;;  %s1889_s5 = inlined_call_operand.vmem [shape: f32[8,1], index: 5, kind: input, shape index: {}]   ;;  %s1890_s6 = inlined_call_operand.hbm [shape: f32[8,8], index: 6, kind: input, shape index: {}]   ;;  %s1891_s7 = inlined_call_operand.vmem [shape: f32[8,1], index: 7, kind: input, shape index: {}]   ;;  %s1892_s8 = inlined_call_operand.vmem [shape: f32[2,8,8], index: 8, kind: input, shape index: {}]   ;;  %s1893_s9 = inlined_call_operand.vmem [shape: f32[8,1], index: 9, kind: input, shape index: {}]   ;;  %s1894_s10 = inlined_call_operand.vmem [shape: f32[2,8,8], index: 10, kind: input, shape index: {}]   ;;  %s1895_s11 = inlined_call_operand.vmem [shape: f32[8,1], index: 11, kind: input, shape index: {}]   ;;  %s1896_s12 = inlined_call_operand.hbm [shape: f32[8,256], index: 12, kind: output, shape index: {}]  }
   0x1   :  { %18 = vsyncpa [#allocation6], 0 }
   0x2   :  { %19 = vsyncpa [#allocation4], 0 }
   0x3   :  { %21 = vsyncpa [#allocation4 + $0x1], 0  ;;  %s1635_s21 = smov 0   ;;  %s1637_s22 = smov 0  }
   0x4   :  { %s1639_s23 = smov 0   ;;  %s1641_s24 = smov 0  }
   0x5 LB: > { %1904 = sst [smem:[#allocation11_spill]] %s1555_s23  ;;  %s1656_s25 = sadd.s32 4294967295, %s1559_s24   ;;  %s1559_s24 = sphi %s1641_s24, %s1920_s24   ;;  %s1555_s23 = sphi %s1639_s23, %s1922_s23   ;;  %s1551_s22 = sphi %s1637_s22, %s1924_s22   ;;  %s1547_s21 = sphi %s1635_s21, %s1923_s21  }
   0x6   : > { %s1272_s26 = sadd.s32 4294967294, %s1559_s24   ;;  %s1660_s27 = sadd.s32 1, %s1559_s24  }
   0x7   : > { %1905 = sst [smem:[#allocation12_spill]] %s1660_s27  ;;  %s291_s28 = sadd.s32 1, %s1555_s23 }
   0x8   : > { %s288_s29 = ssub.s32 %s1559_s24, %s1660_s27  ;;  %p301_p0 = scmp.ne.s32.totalorder %s1555_s23, %s1551_s22 }
   0x9   : > { %p289_p1 = scmp.eq.s32.totalorder %s288_s29, 0  ;;  %p302_p2 = scmp.eq.s32.totalorder %s1656_s25, 1 }
   0xa   : > { %p307_p3 = scmp.ne.s32.totalorder %s1551_s22, %s1547_s21  ;;  %p308_p4 = scmp.eq.s32.totalorder %s1272_s26, 1 }
   0xb   : > { %s1671_s30 = scalar_select %p289_p1, %s1555_s23, %s291_s28  }
   0xc   : > { %p1673_p5 = por %p302_p2, %p301_p0  ;;  %p1677_p6 = por %p308_p4, %p307_p3 }
   0xd   : > { %1906 = sst [smem:[#allocation13_spill]] %s1671_s30  ;;  %p1273_p7 = scmp.ge.s32.totalorder %s1559_s24, 1 }
   0xe   : > { %s1907_s13 = scalar_select %p1673_p5, 1, 0 }
   0xf   : > { %s1908_s14 = scalar_select %p1677_p6, 1, 0 }
  0x10   : > { %p315_p8 = scmp.lt.s32.totalorder %s1559_s24, 3  ;;  %p1900_p9 = scmp.eq.s32.totalorder %s1656_s25, 0 }
  0x11   : > { %1909 = sst [smem:[#allocation14_spill]] %s1908_s14  ;;  %s1561_s16 = smov [#allocation2]  }
  0x12   : > { %p1684_p10 = pnand %p1273_p7, %p315_p8  ;;  %s328_s17 = sshll.u32 %s1561_s16, 4  ;;  %s329_s17 = int_to_ptr.vmem [resolvable:$true] %s328_s17 }
  0x13   : > { %s1562_s18 = smov [#allocation5]   ;;  %s1433_s29 = scalar_lea.hbm %s1884_s0, 64 }
  0x14   : > { %s1910_s15 = scalar_select %p1684_p10, 1, 0 }
  0x15   : > { %p1375_p11 = pneg %p1684_p10  ;;  %s351_s19 = sshll.u32 %s1562_s18, 4  ;;  %s1696_s19 = int_to_ptr.vmem [resolvable:$true] %s351_s19 }
  0x16   : > { %p1434_p13 = scmp.ne.s32.totalorder %s1884_s0, %s1433_s29  ;;  %p1440_p3 = scmp.lt.u32.totalorder %s1433_s29, %s1884_s0 }
  0x17   : > { %p1692_p12 = pnand %p1900_p9, %p1375_p11 }
  0x19   : > { %p1435_p0 = pneg %p1692_p12 }
  0x1b   : > { %p1436_p1 = pnand %p1435_p0, %p1434_p13 }
  0x1d   : > { %p1437_p2 = pneg %p1436_p1 }
  0x1f   : > { %p1442_p4 = pnand %p1440_p3, %p1437_p2 }
  0x21   : > { %1445 = shalt.err (!%p1442_p4)
}
  0x22   : > { %s1446_s27 = scalar_lea.vmem %s329_s17, 64  ;;  %p1454_p9 = scmp.lt.s32.totalorder %s329_s17, %s329_s17 }
  0x23   : > { %p1447_p7 = scmp.ne.s32.totalorder %s329_s17, %s1446_s27  ;;  %p1455_p6 = scmp.lt.s32.totalorder %s1446_s27, %s1446_s27 }
  0x25   : > { %p1449_p8 = pnand %p1447_p7, %p1435_p0  ;;  %p1456_p5 = por %p1455_p6, %p1454_p9 }
  0x27   : > { %p1450_p11 = pneg %p1449_p8 }
  0x29   : > { %p1457_p10 = pnand %p1456_p5, %p1450_p11 }
  0x2b   : > { %1460 = shalt.err (!%p1457_p10)
}
  0x2c   : > { %1378 = dma.hbm_to_vmem [thread:$0]  (!%p1692_p12), %s1884_s0, 64, %s329_s17, [#allocation3]  }
  0x2d   : > { %s1461_s29 = scalar_lea.hbm %s1890_s6, 128 }
  0x2e   : > { %p1462_p13 = scmp.ne.s32.totalorder %s1890_s6, %s1461_s29  ;;  %p1468_p9 = scmp.lt.u32.totalorder %s1461_s29, %s1890_s6 }
  0x30   : > { %p1464_p6 = pnand %p1462_p13, %p1435_p0 }
  0x32   : > { %p1465_p5 = pneg %p1464_p6 }
  0x34   : > { %p1470_p10 = pnand %p1468_p9, %p1465_p5 }
  0x36   : > { %1473 = shalt.err (!%p1470_p10)
}
  0x37   : > { %s1474_s17 = scalar_lea.vmem %s1696_s19, 128  ;;  %p1482_p4 = scmp.lt.s32.totalorder %s1696_s19, %s1696_s19 }
  0x38   : > { %p1475_p1 = scmp.ne.s32.totalorder %s1696_s19, %s1474_s17  ;;  %p1483_p7 = scmp.lt.s32.totalorder %s1474_s17, %s1474_s17 }
  0x3a   : > { %p1477_p2 = pnand %p1475_p1, %p1435_p0  ;;  %p1484_p8 = por %p1483_p7, %p1482_p4 }
  0x3c   : > { %p1478_p3 = pneg %p1477_p2 }
  0x3e   : > { %p1485_p11 = pnand %p1484_p8, %p1478_p3 }
  0x40   : > { %1488 = shalt.err (!%p1485_p11)
}
  0x41   : > { %1381 = dma.hbm_to_vmem [thread:$0]  (!%p1692_p12), %s1890_s6, 128, %s1696_s19, [#allocation6]  }
  0x42   : > { %p1912_p13 = scmp.ne.s32.totalorder %s1910_s15, 0 }
  0x43   : > { %p1913_p6 = scmp.eq.s32.totalorder (!%p1912_p13), %s1656_s25, 0 }
  0x44   : > { %386 = sbr.rel (%p1912_p13) target bundleno = 1453 (0x5ad), region = 68 }
  0x4b   : > { %1534 = dma.done.wait (%p1913_p6), [#allocation3], 64   ;;  %p1914_p0 = pmov %p1913_p6 }
  0x4d   : > { %1536 = vsyncadd (%p1914_p0), [#allocation3], 4294967232  ;;  %p1915_p5 = pmov %p1914_p0 }
  0x4e   : > { %p1916_p9 = pmov %p1914_p0 }
  0x4f   : > { %1538 = dma.done.wait (%p1915_p5), [#allocation6], 128  }
  0x50   : > { %1540 = vsyncadd (%p1916_p9), [#allocation6], 4294967168  ;;  %p431_p10 = scmp.lt.s32.totalorder %s1656_s25, 1  ;;  %v1563_v0 = vmov 0.0   ;;  %vm1564_vm0 = vmmov 0   ;;  %v1565_v1 = vmov 0  }
  0x51   : > { %1320 = vmatprep.subr.mxu0 %v1563_v0  ;;  %1322 = vmatprep.mubr.msk.f32.mxu0 %vm1564_vm0, %v1563_v0  ;;  %vm447_vm1 = vcmask 64512   ;;  %v1283_v3 = vld [vmem:[%s1886_s2 + $0x8] sm:$0xff]  ;;  %s1566_s16 = smov 1   ;;  %v594_v4 = vld [vmem:[%s1887_s3] sm:$0xff]  ;;  %s1568_s28 = smov 4  }
  0x52   : > { %s432_s15 = scalar_select %p431_p10, %s1656_s25, 1  ;;  %1325 = vmatprep.subr.mxu1 %v1563_v0  ;;  %1327 = vmatprep.mubr.msk.f32.mxu1 %vm1564_vm0, %v1563_v0  ;;  %v1282_v5 = vld [vmem:[#allocation2] ss:$0 sm:$0xff]  ;;  %v1287_v17 = vld [vmem:[%s1888_s4 + $0x8] sm:$0xff]  ;;  %v1286_v23 = vld [vmem:[#allocation2 + $0x1] ss:$0 sm:$0xff] }
  0x53   : > { %1431 = vset.pattern.permute.xlu0 %v1565_v1  ;;  %1432 = vset.pattern.permute.xlu1 %v1565_v1  ;;  %v444_v8 = vld [vmem:[%s1886_s2] sm:$0xff]  ;;  %v1291_v41 = vld [vmem:[%s1892_s8 + $0x8] sm:$0xff]  ;;  %s428_s18 = sand.u32 1, %s1551_s22   ;;  %s1299_s17 = sshll.u32 %s1656_s25, 7 }
  0x54   : > { %s1281_s19 = sshll.u32 %s432_s15, 3  ;;  %v759_v18 = vld [vmem:[%s1889_s5] sm:$0xff]  ;;  %v1295_v53 = vld [vmem:[%s1894_s10 + $0x8] sm:$0xff]  ;;  %s1280_s27 = sshll.u32 %s428_s18, 3 }
  0x55   : > { %s434_s23 = scalar_lea.vmem %s1885_s1, %s1281_s19  ;;  %s1567_s19 = smov 2   ;;  %v767_v19 = vld [vmem:[#allocation5] sm:$0xff]  ;;  %v1294_v54 = vld [vmem:[#allocation2 + $0x2] ss:$0 sm:$0xff] }
  0x56   : > { %v435_v2 = vld [vmem:[%s434_s23] sm:$0xff]  ;;  %s430_s14 = scalar_lea.vmem [#allocation7], %s1280_s27  ;;  %s1842_s26 = scalar_lea.hbm %s1896_s12, %s1299_s17 }
  0x57   : > { %436 = vrot.lane.b32.xlu0 %v435_v2, %s1566_s16  ;;  %1321 = vmatpush3.msra.mxu0 %v435_v2  ;;  %v768_v20 = vld [vmem:[%s1891_s7] sm:$0xff]  ;;  %s1191_s30 = sshll.u32 %s430_s14, 4  ;;  %p1917_p1 = scmp.ne.s32.totalorder %s1907_s13, 0  ;;  %s1844_s30 = int_to_ptr.vmem [resolvable:$true] %s1191_s30 }
  0x58   : > { %1323 = vmatmul.mubr.msk.f32.vlgmr.msra.gmra.mrb[0].mxu0 %vm447_vm1, %v1283_v3  ;;  %1330 = vmatprep.subr.mxu0 %v1563_v0  ;;  %v1001_v21 = vld [vmem:[%s1893_s9] sm:$0xff]  ;;  %s1489_s23 = scalar_lea.vmem %s1844_s30, 128  ;;  %s1569_s25 = smov [#allocation7]  }
  0x59   : > { %1332 = vmatprep.mubr.msk.f32.mxu0 %vm1564_vm0, %v1563_v0  ;;  %v1166_v22 = vld [vmem:[%s1895_s11] sm:$0xff]  ;;  %p1490_p12 = scmp.ne.s32.totalorder %s1844_s30, %s1489_s23 }
  0x5a   : > { %v610_v26 = vld [vmem:[%s1888_s4] sm:$0xff] }
  0x5b   : > { %597 = vperm.xlu0 %1431, %v594_v4   ;;  %v852_v44 = vld [vmem:[%s1892_s8] sm:$0xff]  ;;  %p1491_p2 = pnand %p1490_p12, %p1917_p1 }
  0x5c   : > { %v1017_v57 = vld [vmem:[%s1894_s10] sm:$0xff] }
  0x5d   : > { %p1492_p3 = pneg %p1491_p2 }
  0xc9   : > { %v437_v6 = vpop.permute.xlu0 %436 }
  0xca   : > { %v443_v7 = vmul.f32 %v1282_v5, %v437_v6 }
  0xcc   : > { %1326 = vmatpush3.msra.mxu1 %v443_v7 }
  0xcd   : > { %1328 = vmatmul.mubr.msk.f32.vlgmr.msra.gmra.mrb[0].mxu1 %vm447_vm1, %v444_v8  ;;  %1335 = vmatprep.subr.mxu1 %v1563_v0 }
  0xce   : > { %1337 = vmatprep.mubr.msk.f32.mxu1 %vm1564_vm0, %v1563_v0 }
  0xda   : > { %v598_v12 = vpop.permute.xlu0 %597 }
 0x12b   : > { %v517_v9 = vpop.f32.mrb[0].mxu0 }
 0x12c   : > { %v1324_v10 = vpop.f32.mrb[1].mxu0 }
 0x1a0   : > { %v590_v11 = vpop.f32.mrb[0].mxu1 }
 0x1a1   : > { %v591_v13 = vadd.f32 %v590_v11, %v517_v9  ;;  %v1329_v14 = vpop.f32.mrb[1].mxu1 }
 0x1a3   : > { %v600_v15 = vadd.f32 %v598_v12, %v591_v13 }
 0x1a5   : > { %v601_v16 = vmax.f32 %v600_v15, 0.0 }
 0x1a7   : > { %602 = vrot.lane.b32.xlu1 %v601_v16, %s1567_s19  ;;  %1331 = vmatpush3.msra.mxu0 %v601_v16 }
 0x1a8   : > { %1333 = vmatmul.mubr.msk.f32.vlgmr.msra.gmra.mrb[2].mxu0 %vm447_vm1, %v1287_v17  ;;  %1340 = vmatprep.subr.mxu0 %v1563_v0 }
 0x1a9   : > { %1341 = vmatpush3.msra.mxu0 %v435_v2  ;;  %1342 = vmatprep.mubr.msk.f32.mxu0 %vm1564_vm0, %v1563_v0 }
 0x1aa   : > { %1350 = vmatprep.subr.mxu0 %v1563_v0 }
 0x1ab   : > { %762 = vperm.xlu1 %1432, %v759_v18  }
 0x1ac   : > { %1343 = vmatmul.mubr.msk.f32.vlgmr.msra.gmra.mrb[4].mxu0 %vm447_vm1, %v767_v19 }
 0x1ad   : > { %1352 = vmatprep.mubr.msk.f32.mxu0 %vm1564_vm0, %v1563_v0 }
 0x1af   : > { %771 = vperm.xlu1 %1432, %v768_v20  }
 0x1b3   : > { %1004 = vperm.xlu1 %1432, %v1001_v21  }
 0x1b7   : > { %1169 = vperm.xlu1 %1432, %v1166_v22  }
 0x219   : > { %v603_v24 = vpop.permute.xlu1 %602 }
 0x21a   : > { %v609_v25 = vmul.f32 %v1286_v23, %v603_v24 }
 0x21c   : > { %1336 = vmatpush3.msra.mxu1 %v609_v25 }
 0x21d   : > { %1338 = vmatmul.mubr.msk.f32.vlgmr.msra.gmra.mrb[2].mxu1 %vm447_vm1, %v610_v26  ;;  %1345 = vmatprep.subr.mxu1 %v1563_v0 }
 0x21e   : > { %1347 = vmatprep.mubr.msk.f32.mxu1 %vm1564_vm0, %v1563_v0 }
 0x22a   : > { %v763_v31 = vpop.permute.xlu1 %762 }
 0x22e   : > { %v772_v36 = vpop.permute.xlu1 %771 }
 0x232   : > { %v1005_v50 = vpop.permute.xlu1 %1004 }
 0x236   : > { %v1170_v63 = vpop.permute.xlu1 %1169 }
 0x27b   : > { %v682_v27 = vpop.f32.mrb[2].mxu0 }
 0x27c   : > { %v1334_v28 = vpop.f32.mrb[3].mxu0 }
 0x27f   : > { %v843_v29 = vpop.f32.mrb[4].mxu0 }
 0x280   : > { %v1344_v30 = vpop.f32.mrb[5].mxu0  ;;  %v844_v38 = vadd.f32 %v843_v29, %v772_v36 }
 0x2f0   : > { %v755_v32 = vpop.f32.mrb[2].mxu1 }
 0x2f1   : > { %v756_v33 = vadd.f32 %v755_v32, %v682_v27  ;;  %v1339_v34 = vpop.f32.mrb[3].mxu1 }
 0x2f3   : > { %v765_v35 = vadd.f32 %v763_v31, %v756_v33 }
 0x2f5   : > { %v766_v37 = vmax.f32 %v765_v35, 0.0 }
 0x2f7   : > { %v847_v39 = vadd.f32 %v844_v38, %v766_v37 }
 0x2f9   : > { %v848_v40 = vmax.f32 %v847_v39, 0.0 }
 0x2fb   : > { %849 = vrot.lane.b32.xlu0 %v848_v40, %s1567_s19  ;;  %1346 = vmatpush3.msra.mxu1 %v848_v40  ;;  %s1178_s19 = scalar_lea.sflag [#allocation4], %s428_s18 }
 0x2fc   : > { %1348 = vmatmul.mubr.msk.f32.vlgmr.msra.gmra.mrb[4].mxu1 %vm447_vm1, %v1291_v41  ;;  %1355 = vmatprep.subr.mxu1 %v1563_v0 }
 0x2fd   : > { %1357 = vmatprep.mubr.msk.f32.mxu1 %vm1564_vm0, %v1563_v0 }
 0x36d   : > { %v850_v42 = vpop.permute.xlu0 %849 }
 0x36e   : > { %v851_v43 = vmul.f32 %v1286_v23, %v850_v42 }
 0x370   : > { %1351 = vmatpush3.msra.mxu0 %v851_v43 }
 0x371   : > { %1353 = vmatmul.mubr.msk.f32.vlgmr.msra.gmra.mrb[6].mxu0 %vm447_vm1, %v852_v44  ;;  %1360 = vmatprep.subr.mxu0 %v1563_v0 }
 0x372   : > { %1362 = vmatprep.mubr.msk.f32.mxu0 %vm1564_vm0, %v1563_v0 }
 0x3cf   : > { %v924_v45 = vpop.f32.mrb[4].mxu1 }
 0x3d0   : > { %v1349_v46 = vpop.f32.mrb[5].mxu1 }
 0x444   : > { %v997_v47 = vpop.f32.mrb[6].mxu0 }
 0x445   : > { %v998_v48 = vadd.f32 %v997_v47, %v924_v45  ;;  %v1354_v49 = vpop.f32.mrb[7].mxu0 }
 0x447   : > { %v1007_v51 = vadd.f32 %v1005_v50, %v998_v48 }
 0x449   : > { %v1008_v52 = vmax.f32 %v1007_v51, 0.0 }
 0x44b   : > { %1009 = vrot.lane.b32.xlu0 %v1008_v52, %s1568_s28  ;;  %1356 = vmatpush3.msra.mxu1 %v1008_v52  ;;  %s1493_s28 = sshll.u32 %s1569_s25, 4  ;;  %s1494_s28 = int_to_ptr.vmem [resolvable:$false] %s1493_s28 }
 0x44c   : > { %1358 = vmatmul.mubr.msk.f32.vlgmr.msra.gmra.mrb[6].mxu1 %vm447_vm1, %v1295_v53  ;;  %s1495_s29 = scalar_lea.vmem %s1494_s28, 256  ;;  %p1496_p4 = scmp.lt.s32.totalorder %s1844_s30, %s1494_s28 }
 0x44d   : > { %p1497_p7 = scmp.lt.s32.totalorder %s1495_s29, %s1489_s23 }
 0x44f   : > { %p1498_p8 = por %p1497_p7, %p1496_p4 }
 0x451   : > { %p1499_p11 = pnand %p1498_p8, %p1492_p3 }
 0x4bd   : > { %v1010_v55 = vpop.permute.xlu0 %1009 }
 0x4be   : > { %v1016_v56 = vmul.f32 %v1294_v54, %v1010_v55 }
 0x4c0   : > { %1361 = vmatpush3.msra.mxu0 %v1016_v56 }
 0x4c1   : > { %1363 = vmatmul.mubr.msk.f32.vlgmr.msra.gmra.mrb[8].mxu0 %vm447_vm1, %v1017_v57 }
 0x51f   : > { %v1089_v58 = vpop.f32.mrb[6].mxu1 }
 0x520   : > { %v1359_v59 = vpop.f32.mrb[7].mxu1 }
 0x594   : > { %v1162_v60 = vpop.f32.mrb[8].mxu0 }
 0x595   : > { %v1163_v61 = vadd.f32 %v1162_v60, %v1089_v58  ;;  %v1364_v62 = vpop.f32.mrb[9].mxu0 }
 0x597   : > { %v1172_v0 = vadd.f32 %v1170_v63, %v1163_v61 }
 0x599   : > { %v1173_v1 = vmax.f32 %v1172_v0, 0.0 }
 0x59b   : > { %v1174_v2 = vadd.f32 %v1173_v1, %v848_v40 }
 0x59d   : > { %v1175_v3 = vmax.f32 %v1174_v2, 0.0 }
 0x59f   : > { %1176 = vst [vmem:[%s430_s14] sm:$0xff] %v1175_v3 }
 0x5a0   : > { %1502 = shalt.err (!%p1499_p11)
}
 0x5a1   : > { %s1503_s16 = scalar_lea.hbm %s1842_s26, 128  ;;  %s1507_s17 = scalar_lea.hbm %s1896_s12, 256 }
 0x5a2   : > { %p1504_p13 = scmp.ne.s32.totalorder %s1842_s26, %s1503_s16  ;;  %p1508_p5 = scmp.lt.u32.totalorder %s1842_s26, %s1896_s12 }
 0x5a3   : > { %p1509_p9 = scmp.lt.u32.totalorder %s1507_s17, %s1503_s16  ;;  %p1511_p12 = scmp.lt.u32.totalorder %s1503_s16, %s1842_s26 }
 0x5a4   : > { %p1505_p6 = pnand %p1504_p13, %p1917_p1 }
 0x5a5   : > { %p1510_p10 = por %p1509_p9, %p1508_p5 }
 0x5a6   : > { %p1506_p0 = pneg %p1505_p6 }
 0x5a7   : > { %p1512_p2 = por %p1511_p12, %p1510_p10 }
 0x5a9   : > { %p1513_p3 = pnand %p1512_p2, %p1506_p0 }
 0x5ab   : > { %1516 = shalt.err (!%p1513_p3)
}
 0x5ac   : > { %1373 = dma.vmem_to_hbm [thread:$0]  (%p1917_p1), %s1844_s30, 128, %s1842_s26, %s1178_s19  }
 0x5ad PF: > { %s1918_s20 = sld [smem:[#allocation14_spill]]  ;;  %p1390_p4 = scmp.ge.s32.totalorder %s1559_s24, 2 }
 0x5ae   : > { %s1203_s23 = sand.u32 1, %s1547_s21  }
 0x5af   : > { %s1204_s25 = scalar_lea.sflag [#allocation4], %s1203_s23 }
 0x5b3   : > { %p1919_p7 = scmp.ne.s32.totalorder %s1918_s20, 0 }
 0x5b5   : > { %p1383_p8 = pnand %p1390_p4, %p1919_p7 }
 0x5b7   : > { %1542 = dma.done.wait (!%p1383_p8), %s1204_s25, 128  }
 0x5b8   : > { %1544 = vsyncadd (!%p1383_p8), %s1204_s25, 4294967168  ;;  %s1920_s24 = sld [smem:[#allocation12_spill]]  ;;  %s1921_s28 = sld [smem:[#allocation11_spill]] }
 0x5b9   : > { %s1922_s23 = sld [smem:[#allocation13_spill]]  ;;  %s1923_s21 = smov %s1551_s22 }
 0x5be   : > { %p24_p11 = scmp.ge.s32.totalorder %s1920_s24, 4   ;;  %s1924_s22 = smov %s1921_s28 }
 0x5c0   :  { %26 = sbr.rel (!%p24_p11) target bundleno = 5 (0x5), region = 116 }
 0x5c7   :  { %1209 = vsyncpa [#allocation3], 1 }
 0x5c8   :  { %1211 = vsyncpa [#allocation3 + $0x1], 1 }
 0x5c9   :  { %1212 = vsyncpa [#allocation6], 1 }
 0x5ca   :  { %1213 = vsyncpa [#allocation4], 1 }
 0x5cb   :  { %1215 = vsyncpa [#allocation4 + $0x1], 1 }

</bundles_post_ra>
